<compile_context>
chip_gen: v6e
topology: v6e:2x2x1
jax: 0.10.0
libtpu: 0.0.40
codegen_flags: <defaults>
</compile_context>

<pallas_src>
import functools

import jax
import jax.numpy as jnp
from jax.experimental import pallas as pl
from jax.experimental.pallas import tpu as pltpu


def _quadruplet_kernel(a_ref, p_ref, n1_ref, n2_ref, loss_ref, *,
                       margin_a, margin_b):
    """Per-row quadruplet loss for one (block_b, D) batch tile."""
    a = a_ref[...]
    p = p_ref[...]
    n1 = n1_ref[...]
    n2 = n2_ref[...]
    if a.dtype != jnp.float32:
        a = a.astype(jnp.float32)
        p = p.astype(jnp.float32)
        n1 = n1.astype(jnp.float32)
        n2 = n2.astype(jnp.float32)

    d_ap = a - p
    d_an1 = a - n1
    d_n1n2 = n1 - n2

    sq_ap = d_ap * d_ap
    # Fold three row reductions into two: the extra VPU subtracts are free
    # (4 VALU slots/cycle of slack) while each axis=1 sum is an XLU
    # cross-lane reduce — cut XLU work by 33%.
    e1 = sq_ap - d_an1 * d_an1        # (a-p)^2 - (a-n1)^2
    e2 = sq_ap - d_n1n2 * d_n1n2      # (a-p)^2 - (n1-n2)^2

    s1 = jnp.sum(e1, axis=1, keepdims=True)   # (block_b, 1)
    s2 = jnp.sum(e2, axis=1, keepdims=True)   # (block_b, 1)

    losses = (jnp.maximum(s1 + margin_a, 0.0)
              + jnp.maximum(s2 + margin_b, 0.0))

    loss_ref[...] = losses  # (block_b, 1); OOB rows of a partial block are dropped.


def _vmem_capacity_bytes():
    """Physical VMEM per TensorCore; conservative fallback if query fails."""
    try:
        info = pltpu.get_tpu_info()
        cap = getattr(info, "vmem_capacity_bytes", None)
        if cap:
            return int(cap)
    except Exception:
        pass
    return 64 << 20  # v7x per-TC VMEM — the smallest of v5e/v6e/v7x


def _vmem_plan():
    cap = _vmem_capacity_bytes()
    # Tile-pick budget: ~5/8 of physical, capped at 48 MiB so v7x's 64 MiB
    # keeps headroom for Mosaic internal scratch; scoped limit sits above the
    # budget (and above the 16/32 MiB defaults) but below physical.
    budget = min(48 << 20, (cap * 5) // 8)
    limit = min(cap - (4 << 20), budget + (12 << 20))
    return budget, limit


def _pick_block_b(B, D, itemsize, budget_bytes, *, max_block=8192):
    """Largest batch tile fitting the VMEM budget, with >=2 grid steps when possible."""
    sub = {4: 8, 2: 16, 1: 32}.get(int(itemsize), 8)   # sublane packing per dtype
    # 4 input streams x 2 pipeline buffers (input dtype) + ~8 f32 tile-sized
    # intermediates (upcasts, diffs, squares, e1/e2) materialized in the body.
    per_row = 4 * 2 * D * int(itemsize) + 8 * D * 4
    bb = min(max_block, max(budget_bytes // max(per_row, 1), sub))
    bb = max((bb // sub) * sub, sub)
    if bb >= B:
        if B <= sub:
            return B          # block == full array dims is always legal (grid=1)
        # Keep at least 2 grid steps so megacore (v7x: 2 TCs) can shard the
        # "parallel" batch axis.  v5e/v6e just pay one extra ~0.35us step.
        half = pl.cdiv(B, 2)
        bb = max((half // sub) * sub, sub)
    return bb


def quadruplet_loss(anchor, positive, negative1, negative2, *,
                    margin_a, margin_b, size_average=True, block_b=None):
    B, D = anchor.shape
    itemsize = jnp.dtype(anchor.dtype).itemsize
    budget_bytes, vmem_limit = _vmem_plan()
    if block_b is None:
        block_b = _pick_block_b(B, D, itemsize, budget_bytes)

    grid = (pl.cdiv(B, block_b),)

    in_spec = pl.BlockSpec((block_b, D), lambda i: (i, 0))
    out_spec = pl.BlockSpec((block_b, 1), lambda i: (i, 0))

    kernel = functools.partial(_quadruplet_kernel,
                               margin_a=float(margin_a),
                               margin_b=float(margin_b))

    losses = pl.pallas_call(
        kernel,
        out_shape=jax.ShapeDtypeStruct((B, 1), jnp.float32),
        grid_spec=pltpu.PrefetchScalarGridSpec(
            num_scalar_prefetch=0,
            grid=grid,
            in_specs=[in_spec, in_spec, in_spec, in_spec],
            out_specs=out_spec,
        ),
        compiler_params=pltpu.CompilerParams(
            dimension_semantics=("parallel",),   # independent batch tiles
            vmem_limit_bytes=int(vmem_limit),
        ),
    )(anchor, positive, negative1, negative2)

    total = jnp.sum(losses)
    if size_average:
        return total / jnp.float32(B)
    return total


def _reference(anchor, positive, negative1, negative2, margin_a, margin_b,
               size_average=True):
    a = anchor.astype(jnp.float32)
    p = positive.astype(jnp.float32)
    n1 = negative1.astype(jnp.float32)
    n2 = negative2.astype(jnp.float32)
    dp = jnp.sum((a - p) ** 2, axis=1)
    dn1 = jnp.sum((a - n1) ** 2, axis=1)
    dn2 = jnp.sum((n1 - n2) ** 2, axis=1)
    losses = (jax.nn.relu(dp - dn1 + margin_a)
              + jax.nn.relu(dp - dn2 + margin_b))
    return jnp.mean(losses) if size_average else jnp.sum(losses)


if __name__ == "__main__":
    key = jax.random.PRNGKey(0)
    margin_a, margin_b = 1.0, 0.5

    B, D = 16, 128
    k1, k2, k3, k4 = jax.random.split(key, 4)
    anchor = jax.random.normal(k1, (B, D), dtype=jnp.float32)
    positive = jax.random.normal(k2, (B, D), dtype=jnp.float32)
    negative1 = jax.random.normal(k3, (B, D), dtype=jnp.float32)
    negative2 = jax.random.normal(k4, (B, D), dtype=jnp.float32)

    # Case 1: f32, size_average=True (mean).  Auto block pick gives a 2-step
    # parallel grid (exercises the megacore-friendly path).
    out = quadruplet_loss(anchor, positive, negative1, negative2,
                          margin_a=margin_a, margin_b=margin_b,
                          size_average=True)
    out = jax.block_until_ready(out)
    ref = _reference(anchor, positive, negative1, negative2,
                     margin_a, margin_b, size_average=True)
    assert jnp.allclose(out, ref, rtol=1e-4, atol=1e-4), (out, ref)

    # Case 2: ragged batch (exercises pl.cdiv + partial final block) with sum.
    B2 = 13
    out2 = quadruplet_loss(anchor[:B2], positive[:B2],
                           negative1[:B2], negative2[:B2],
                           margin_a=margin_a, margin_b=margin_b,
                           size_average=False, block_b=8)
    out2 = jax.block_until_ready(out2)
    ref2 = _reference(anchor[:B2], positive[:B2], negative1[:B2],
                      negative2[:B2], margin_a, margin_b, size_average=False)
    assert jnp.allclose(out2, ref2, rtol=1e-4, atol=1e-4), (out2, ref2)

    # Case 3: bf16 inputs (halved HBM traffic; kernel upcasts to f32).
    out3 = quadruplet_loss(anchor.astype(jnp.bfloat16),
                           positive.astype(jnp.bfloat16),
                           negative1.astype(jnp.bfloat16),
                           negative2.astype(jnp.bfloat16),
                           margin_a=margin_a, margin_b=margin_b,
                           size_average=True)
    out3 = jax.block_until_ready(out3)
    ref3 = _reference(anchor.astype(jnp.bfloat16),
                      positive.astype(jnp.bfloat16),
                      negative1.astype(jnp.bfloat16),
                      negative2.astype(jnp.bfloat16),
                      margin_a, margin_b, size_average=True)
    assert jnp.allclose(out3, ref3, rtol=2e-4, atol=2e-4), (out3, ref3)

    print("KERNEL_OK")
</pallas_src>

<mosaic_0001>
module attributes {stable_mosaic.version = 11 : i64} {
  func.func @_quadruplet_kernel(%arg0: i32, %arg1: memref<8x128xf32, #tpu.memory_space<vmem>>, %arg2: memref<8x128xf32, #tpu.memory_space<vmem>>, %arg3: memref<8x128xf32, #tpu.memory_space<vmem>>, %arg4: memref<8x128xf32, #tpu.memory_space<vmem>>, %arg5: memref<8x1xf32, #tpu.memory_space<vmem>>) attributes {dimension_semantics = [#tpu.dimension_semantics<parallel>], iteration_bounds = array<i64: 2>, scalar_prefetch = 0 : i64, scratch_operands = 0 : i64, tpu.core_type = #tpu.core_type<tc>, window_params = [{transform_indices = @transform_0, window_bounds = array<i64: 8, 128>}, {transform_indices = @transform_1, window_bounds = array<i64: 8, 128>}, {transform_indices = @transform_2, window_bounds = array<i64: 8, 128>}, {transform_indices = @transform_3, window_bounds = array<i64: 8, 128>}, {transform_indices = @transform_4, window_bounds = array<i64: 8, 1>}]} {
    %c0 = arith.constant 0 : index
    %c0_0 = arith.constant 0 : index
    %0 = vector.load %arg1[%c0, %c0_0] : memref<8x128xf32, #tpu.memory_space<vmem>>, vector<8x128xf32>
    %c0_1 = arith.constant 0 : index
    %c0_2 = arith.constant 0 : index
    %1 = vector.load %arg2[%c0_1, %c0_2] : memref<8x128xf32, #tpu.memory_space<vmem>>, vector<8x128xf32>
    %c0_3 = arith.constant 0 : index
    %c0_4 = arith.constant 0 : index
    %2 = vector.load %arg3[%c0_3, %c0_4] : memref<8x128xf32, #tpu.memory_space<vmem>>, vector<8x128xf32>
    %c0_5 = arith.constant 0 : index
    %c0_6 = arith.constant 0 : index
    %3 = vector.load %arg4[%c0_5, %c0_6] : memref<8x128xf32, #tpu.memory_space<vmem>>, vector<8x128xf32>
    %4 = arith.subf %0, %1 : vector<8x128xf32>
    %5 = arith.subf %0, %2 : vector<8x128xf32>
    %6 = arith.subf %2, %3 : vector<8x128xf32>
    %7 = arith.mulf %4, %4 : vector<8x128xf32>
    %8 = arith.mulf %5, %5 : vector<8x128xf32>
    %9 = arith.subf %7, %8 : vector<8x128xf32>
    %10 = arith.mulf %6, %6 : vector<8x128xf32>
    %11 = arith.subf %7, %10 : vector<8x128xf32>
    %cst = arith.constant dense<0.000000e+00> : vector<8xf32>
    %12 = vector.multi_reduction <add>, %9, %cst [1] : vector<8x128xf32> to vector<8xf32>
    %13 = vector.shape_cast %12 : vector<8xf32> to vector<8x1xf32>
    %cst_7 = arith.constant dense<0.000000e+00> : vector<8xf32>
    %14 = vector.multi_reduction <add>, %11, %cst_7 [1] : vector<8x128xf32> to vector<8xf32>
    %15 = vector.shape_cast %14 : vector<8xf32> to vector<8x1xf32>
    %cst_8 = arith.constant 1.000000e+00 : f32
    %16 = vector.broadcast %cst_8 : f32 to vector<8x1xf32>
    %17 = arith.addf %13, %16 : vector<8x1xf32>
    %cst_9 = arith.constant 0.000000e+00 : f32
    %18 = vector.broadcast %cst_9 : f32 to vector<8x1xf32>
    %19 = arith.maximumf %17, %18 : vector<8x1xf32>
    %cst_10 = arith.constant 5.000000e-01 : f32
    %20 = vector.broadcast %cst_10 : f32 to vector<8x1xf32>
    %21 = arith.addf %15, %20 : vector<8x1xf32>
    %cst_11 = arith.constant 0.000000e+00 : f32
    %22 = vector.broadcast %cst_11 : f32 to vector<8x1xf32>
    %23 = arith.maximumf %21, %22 : vector<8x1xf32>
    %24 = arith.addf %19, %23 : vector<8x1xf32>
    %c0_12 = arith.constant 0 : index
    %c0_13 = arith.constant 0 : index
    %25 = vector.load %arg5[%c0_12, %c0_13] : memref<8x1xf32, #tpu.memory_space<vmem>>, vector<8x1xf32>
    tpu.vector_store %arg5[%c0_12, %c0_13], %24 {strides = array<i32>} : memref<8x1xf32, #tpu.memory_space<vmem>>, vector<8x1xf32>,
    return
  }
  func.func @transform_0(%arg0: i32) -> (i32, i32) {
    %c0_i32 = arith.constant 0 : i32
    %c0_i32_0 = arith.constant 0 : i32
    return %arg0, %c0_i32 : i32, i32
  }
  func.func @transform_1(%arg0: i32) -> (i32, i32) {
    %c0_i32 = arith.constant 0 : i32
    %c0_i32_0 = arith.constant 0 : i32
    return %arg0, %c0_i32 : i32, i32
  }
  func.func @transform_2(%arg0: i32) -> (i32, i32) {
    %c0_i32 = arith.constant 0 : i32
    %c0_i32_0 = arith.constant 0 : i32
    return %arg0, %c0_i32 : i32, i32
  }
  func.func @transform_3(%arg0: i32) -> (i32, i32) {
    %c0_i32 = arith.constant 0 : i32
    %c0_i32_0 = arith.constant 0 : i32
    return %arg0, %c0_i32 : i32, i32
  }
  func.func @transform_4(%arg0: i32) -> (i32, i32) {
    %c0_i32 = arith.constant 0 : i32
    %c0_i32_0 = arith.constant 0 : i32
    return %arg0, %c0_i32 : i32, i32
  }
}

</mosaic_0001>

<bundles_post_ra>
// kernel: tpu_custom_call.1
= control target key start
LH: loop header
LB: loop body
LE: loop exit
PB: predicated region body
PF: predicated region fallthrough
CT: control target
= control target key end

     0   :  { %s935_s0 = inlined_call_operand.hbm [shape: f32[16,128], index: 0, kind: input, shape index: {}]   ;;  %s936_s1 = inlined_call_operand.hbm [shape: f32[16,128], index: 1, kind: input, shape index: {}]   ;;  %s937_s2 = inlined_call_operand.hbm [shape: f32[16,128], index: 2, kind: input, shape index: {}]   ;;  %s938_s3 = inlined_call_operand.hbm [shape: f32[16,128], index: 3, kind: input, shape index: {}]   ;;  %s939_s4 = inlined_call_operand.vmem [shape: f32[16,1], index: 4, kind: output, shape index: {}]  }
   0x1   :  { %941 = sst [smem:[#allocation12_spill]] %s936_s1 }
   0x2   :  { %9 = vsyncpa [#allocation3], 0 }
   0x3   :  { %11 = vsyncpa [#allocation3 + $0x1], 0 }
   0x4   :  { %12 = vsyncpa [#allocation5], 0 }
   0x5   :  { %14 = vsyncpa [#allocation5 + $0x1], 0 }
   0x6   :  { %15 = vsyncpa [#allocation8], 0 }
   0x7   :  { %17 = vsyncpa [#allocation8 + $0x1], 0  ;;  %s733_s15 = smov 0   ;;  %s735_s16 = smov 0  }
   0x8   :  { %s737_s17 = smov 0   ;;  %s739_s18 = smov 0  }
   0x9 LB: > { %s752_s19 = sadd.s32 4294967295, %s702_s18   ;;  %s755_s20 = sadd.s32 1, %s702_s18   ;;  %s702_s18 = sphi %s739_s18, %s954_s18   ;;  %s698_s17 = sphi %s737_s17, %s953_s17   ;;  %s694_s16 = sphi %s735_s16, %s952_s16   ;;  %s690_s15 = sphi %s733_s15, %s951_s15  }
   0xa   : > { %s27_s21 = ssub.s32 %s702_s18, %s755_s20  ;;  %s30_s22 = sadd.s32 1, %s698_s17 }
   0xb   : > { %p28_p0 = scmp.eq.s32.totalorder %s27_s21, 0  ;;  %p37_p1 = scmp.ne.s32.totalorder %s698_s17, %s694_s16 }
   0xc   : > { %p38_p2 = scmp.eq.s32.totalorder %s702_s18, 0  ;;  %p43_p3 = scmp.ne.s32.totalorder %s694_s16, %s690_s15 }
   0xd   : > { %s765_s23 = scalar_select %p28_p0, %s698_s17, %s30_s22  }
   0xe   : > { %p39_p4 = por %p38_p2, %p37_p1  ;;  %p44_p5 = scmp.eq.s32.totalorder %s752_s19, 0 }
   0xf   : > { %p515_p6 = scmp.lt.s32.totalorder %s702_s18, 2  ;;  %s774_s25 = sand.u32 1, %s698_s17  }
  0x10   : > { %p769_p7 = por %p44_p5, %p43_p3  ;;  %s777_s26 = sshll.u32 %s774_s25, 3 }
  0x11   : > { %s780_s27 = sshll.u32 %s702_s18, 7  ;;  %p782_p8 = pnand %p515_p6, %p39_p4 }
  0x12   : > { %s942_s24 = scalar_select %p769_p7, 1, 0 }
  0x13   : > { %s189_s29 = sand.u32 1, %s702_s18   ;;  %s944_s1 = sld [smem:[#allocation12_spill]] }
  0x14   : > { %s193_s7 = scalar_lea.vmem [#allocation4], %s777_s26  ;;  %s796_s9 = scalar_lea.sflag [#allocation5], %s189_s29 }
  0x15   : > { %s200_s8 = sshll.u32 %s193_s7, 4  ;;  %p802_p12 = pneg %p782_p8  ;;  %s201_s8 = int_to_ptr.vmem [resolvable:$true] %s200_s8 }
  0x19   : > { %s791_s6 = scalar_lea.hbm %s944_s1, %s780_s27  ;;  %s553_s14 = scalar_lea.hbm %s944_s1, 256 }
  0x1a   : > { %s548_s10 = scalar_lea.hbm %s791_s6, 128  ;;  %p554_p1 = scmp.lt.s32.totalorder %s791_s6, %s944_s1 }
  0x1b   : > { %p549_p11 = scmp.ne.s32.totalorder %s791_s6, %s548_s10  ;;  %p555_p2 = scmp.lt.s32.totalorder %s553_s14, %s548_s10 }
  0x1d   : > { %p551_p13 = pnand %p802_p12, %p549_p11  ;;  %p556_p3 = por %p555_p2, %p554_p1 }
  0x1f   : > { %p552_p0 = pneg %p551_p13 }
  0x21   : > { %p557_p4 = pnand %p556_p3, %p552_p0 }
  0x23   : > { %560 = shalt.err (!%p557_p4)
}
  0x24   : > { %s561_s22 = scalar_lea.vmem %s201_s8, 128  ;;  %s704_s29 = smov [#allocation4]  }
  0x25   : > { %p562_p5 = scmp.ne.s32.totalorder %s201_s8, %s561_s22  ;;  %s566_s30 = sshll.u32 %s704_s29, 4  ;;  %s567_s30 = int_to_ptr.vmem [resolvable:$false] %s566_s30 }
  0x26   : > { %s568_s5 = scalar_lea.vmem %s567_s30, 256  ;;  %p569_p11 = scmp.lt.s32.totalorder %s201_s8, %s567_s30 }
  0x27   : > { %p564_p6 = pnand %p562_p5, %p802_p12  ;;  %p570_p13 = scmp.lt.s32.totalorder %s568_s5, %s561_s22 }
  0x29   : > { %p565_p9 = pneg %p564_p6  ;;  %p571_p10 = por %p570_p13, %p569_p11 }
  0x2b   : > { %p572_p7 = pnand %p571_p10, %p565_p9 }
  0x2d   : > { %575 = shalt.err (!%p572_p7)
}
  0x2e   : > { %508 = dma.hbm_to_vmem [thread:$0]  (!%p782_p8), %s791_s6, 128, %s201_s8, %s796_s9  }
  0x2f   : > { %p946_p0 = scmp.lt.s32.totalorder %s702_s18, 3  ;;  %p947_p1 = scmp.ge.s32.totalorder %s702_s18, 1 }
  0x30   : > { %s833_s13 = scalar_lea.hbm %s935_s0, %s780_s27  ;;  %s175_s14 = scalar_lea.vmem [#allocation2], %s777_s26 }
  0x31   : > { %p825_p2 = pnand %p947_p1, %p946_p0  ;;  %s182_s15 = sshll.u32 %s175_s14, 4  ;;  %s183_s15 = int_to_ptr.vmem [resolvable:$true] %s182_s15 }
  0x32   : > { %s840_s6 = scalar_lea.hbm %s937_s2, %s780_s27  ;;  %s172_s18 = scalar_lea.sflag [#allocation3], %s774_s25 }
  0x33   : > { %s948_s7 = scalar_select %p825_p2, 1, 0 }
  0x34   : > { %s576_s8 = scalar_lea.hbm %s833_s13, 128  ;;  %s581_s5 = scalar_lea.hbm %s935_s0, 256 }
  0x35   : > { %p577_p7 = scmp.ne.s32.totalorder %s833_s13, %s576_s8  ;;  %p582_p3 = scmp.lt.s32.totalorder %s833_s13, %s935_s0 }
  0x36   : > { %p583_p4 = scmp.lt.s32.totalorder %s581_s5, %s576_s8 }
  0x37   : > { %p579_p9 = pnand %p577_p7, %p802_p12 }
  0x38   : > { %p584_p5 = por %p583_p4, %p582_p3 }
  0x39   : > { %p580_p10 = pneg %p579_p9 }
  0x3b   : > { %p585_p6 = pnand %p584_p5, %p580_p10 }
  0x3d   : > { %588 = shalt.err (!%p585_p6)
}
  0x3e   : > { %s589_s14 = scalar_lea.vmem %s183_s15, 128  ;;  %s705_s21 = smov [#allocation2]  }
  0x3f   : > { %p590_p11 = scmp.ne.s32.totalorder %s183_s15, %s589_s14  ;;  %s594_s22 = sshll.u32 %s705_s21, 4  ;;  %s595_s22 = int_to_ptr.vmem [resolvable:$false] %s594_s22 }
  0x40   : > { %s596_s1 = scalar_lea.vmem %s595_s22, 256  ;;  %p597_p1 = scmp.lt.s32.totalorder %s183_s15, %s595_s22 }
  0x41   : > { %p592_p13 = pnand %p590_p11, %p802_p12  ;;  %p598_p7 = scmp.lt.s32.totalorder %s596_s1, %s589_s14 }
  0x43   : > { %p593_p0 = pneg %p592_p13  ;;  %p599_p9 = por %p598_p7, %p597_p1 }
  0x45   : > { %p600_p2 = pnand %p599_p9, %p593_p0 }
  0x47   : > { %603 = shalt.err (!%p600_p2)
}
  0x48   : > { %505 = dma.hbm_to_vmem [thread:$0]  (!%p782_p8), %s833_s13, 128, %s183_s15, %s172_s18  }
  0x49   : > { %s211_s8 = scalar_lea.vmem [#allocation6], %s777_s26  ;;  %s604_s30 = scalar_lea.hbm %s840_s6, 128 }
  0x4a   : > { %s218_s29 = sshll.u32 %s211_s8, 4  ;;  %p605_p10 = scmp.ne.s32.totalorder %s840_s6, %s604_s30  ;;  %s219_s29 = int_to_ptr.vmem [resolvable:$true] %s218_s29 }
  0x4b   : > { %s609_s10 = scalar_lea.hbm %s937_s2, 256  ;;  %p610_p2 = scmp.lt.s32.totalorder %s840_s6, %s937_s2 }
  0x4c   : > { %p607_p3 = pnand %p605_p10, %p802_p12  ;;  %p611_p5 = scmp.lt.s32.totalorder %s609_s10, %s604_s30 }
  0x4e   : > { %p608_p4 = pneg %p607_p3  ;;  %p612_p6 = por %p611_p5, %p610_p2 }
  0x50   : > { %p613_p11 = pnand %p612_p6, %p608_p4 }
  0x52   : > { %616 = shalt.err (!%p613_p11)
}
  0x53   : > { %s617_s13 = scalar_lea.vmem %s219_s29, 128  ;;  %s706_s15 = smov [#allocation6]  }
  0x54   : > { %p618_p13 = scmp.ne.s32.totalorder %s219_s29, %s617_s13  ;;  %s622_s18 = sshll.u32 %s706_s15, 4  ;;  %s623_s18 = int_to_ptr.vmem [resolvable:$false] %s622_s18 }
  0x55   : > { %s624_s21 = scalar_lea.vmem %s623_s18, 256  ;;  %p625_p7 = scmp.lt.s32.totalorder %s219_s29, %s623_s18 }
  0x56   : > { %p620_p0 = pnand %p618_p13, %p802_p12  ;;  %p626_p9 = scmp.lt.s32.totalorder %s624_s21, %s617_s13 }
  0x58   : > { %p621_p1 = pneg %p620_p0  ;;  %p627_p10 = por %p626_p9, %p625_p7 }
  0x5a   : > { %p628_p3 = pnand %p627_p10, %p621_p1 }
  0x5c   : > { %631 = shalt.err (!%p628_p3)
}
  0x5d   : > { %511 = dma.hbm_to_vmem [thread:$0]  (!%p782_p8), %s840_s6, 128, %s219_s29, %s796_s9  }
  0x5e   : > { %s881_s30 = scalar_lea.hbm %s938_s3, %s780_s27  ;;  %s229_s1 = scalar_lea.vmem [#allocation7], %s777_s26 }
  0x5f   : > { %s236_s5 = sshll.u32 %s229_s1, 4  ;;  %s226_s10 = scalar_lea.sflag [#allocation8], %s774_s25  ;;  %s237_s5 = int_to_ptr.vmem [resolvable:$true] %s236_s5 }
  0x60   : > { %s632_s12 = scalar_lea.hbm %s881_s30, 128  ;;  %s637_s9 = scalar_lea.hbm %s938_s3, 256 }
  0x61   : > { %p633_p4 = scmp.ne.s32.totalorder %s881_s30, %s632_s12  ;;  %p638_p6 = scmp.lt.s32.totalorder %s881_s30, %s938_s3 }
  0x62   : > { %p639_p11 = scmp.lt.s32.totalorder %s637_s9, %s632_s12 }
  0x63   : > { %p635_p2 = pnand %p633_p4, %p802_p12 }
  0x64   : > { %p640_p13 = por %p639_p11, %p638_p6 }
  0x65   : > { %p636_p5 = pneg %p635_p2 }
  0x67   : > { %p641_p0 = pnand %p640_p13, %p636_p5 }
  0x69   : > { %644 = shalt.err (!%p641_p0)
}
  0x6a   : > { %s645_s26 = scalar_lea.vmem %s237_s5, 128  ;;  %s707_s25 = smov [#allocation7]  }
  0x6b   : > { %p646_p1 = scmp.ne.s32.totalorder %s237_s5, %s645_s26  ;;  %s650_s27 = sshll.u32 %s707_s25, 4  ;;  %s651_s27 = int_to_ptr.vmem [resolvable:$false] %s650_s27 }
  0x6c   : > { %s652_s15 = scalar_lea.vmem %s651_s27, 256  ;;  %p653_p10 = scmp.lt.s32.totalorder %s237_s5, %s651_s27 }
  0x6d   : > { %p648_p7 = pnand %p646_p1, %p802_p12  ;;  %p654_p3 = scmp.lt.s32.totalorder %s652_s15, %s645_s26 }
  0x6f   : > { %p649_p9 = pneg %p648_p7  ;;  %p655_p4 = por %p654_p3, %p653_p10 }
  0x71   : > { %p656_p2 = pnand %p655_p4, %p649_p9 }
  0x73   : > { %659 = shalt.err (!%p656_p2)
}
  0x74   : > { %514 = dma.hbm_to_vmem [thread:$0]  (!%p782_p8), %s881_s30, 128, %s237_s5, %s226_s10  }
  0x75   : > { %p949_p5 = scmp.ne.s32.totalorder %s948_s7, 0 }
  0x76   : > { %s247_s11 = sand.u32 (!%p949_p5), 1, %s694_s16   ;;  %p950_p12 = scmp.ne.s32.totalorder (!%p949_p5), %s942_s24, 0 }
  0x77   : > { %245 = sbr.rel (%p949_p5) target bundleno = 288 (0x120), region = 36  ;;  %s487_s18 = sshll.u32 (!%p949_p5), %s247_s11, 3 }
  0x78   : > { %s248_s21 = scalar_lea.sflag (!%p949_p5), [#allocation3], %s247_s11  ;;  %s251_s22 = scalar_lea.vmem (!%p949_p5), [#allocation2], %s487_s18 }
  0x7c   : > { %677 = dma.done.wait (%p950_p12), %s248_s21, 128  }
  0x7d   : > { %679 = vsyncadd (%p950_p12), %s248_s21, 4294967168  ;;  %s256_s8 = sand.u32 1, %s752_s19   ;;  %s260_s1 = scalar_lea.vmem [#allocation4], %s487_s18 }
  0x7e   : > { %s257_s28 = scalar_lea.sflag [#allocation5], %s256_s8 }
  0x7f   : > { %681 = dma.done.wait (%p950_p12), %s257_s28, 256  }
  0x80   : > { %683 = vsyncadd (%p950_p12), %s257_s28, 4294967040  ;;  %s269_s7 = scalar_lea.vmem [#allocation6], %s487_s18  ;;  %s275_s30 = scalar_lea.sflag [#allocation8], %s247_s11 }
  0x81   : > { %s278_s5 = scalar_lea.vmem [#allocation7], %s487_s18 }
  0x82   : > { %685 = dma.done.wait (%p950_p12), %s275_s30, 128  }
  0x83   : > { %687 = vsyncadd (%p950_p12), %s275_s30, 4294967168  ;;  %v321_v0 = vld [vmem:[%s251_s22] sm:$0xff]  ;;  %v322_v1 = vld [vmem:[%s260_s1] sm:$0xff]  ;;  %p317_p8 = scmp.lt.s32.totalorder %s752_s19, 1  ;;  %vm342_vm0 = vcmask 7168  }
  0x84   : > { %v323_v2 = vld [vmem:[%s269_s7] sm:$0xff]  ;;  %v325_v3 = vsub.f32 %v321_v0, %v322_v1  ;;  %v324_v5 = vld [vmem:[%s278_s5] sm:$0xff] }
  0x85   : > { %v326_v4 = vsub.f32 %v321_v0, %v323_v2  ;;  %v327_v6 = vsub.f32 %v323_v2, %v324_v5  ;;  %s956_s19 = smov (!%p317_p8, %s752_s19), 1 }
  0x86   : > { %v328_v7 = vmul.f32 %v325_v3, %v325_v3  ;;  %s491_s24 = sshll.u32 %s956_s19, 3 }
  0x87   : > { %v329_v8 = vmul.f32 %v326_v4, %v326_v4  ;;  %v331_v9 = vmul.f32 %v327_v6, %v327_v6  ;;  %s320_s14 = scalar_lea.vmem %s939_s4, %s491_s24 }
  0x89   : > { %v330_v10 = vsub.f32 %v328_v7, %v329_v8  ;;  %v332_v11 = vsub.f32 %v328_v7, %v331_v9 }
  0x8b   : > { %333 = vadd.xlane.f32.xlu0 %v330_v10 }
  0x8f   : > { %335 = vadd.xlane.f32.xlu0 %v332_v11 }
 0x114   : > { %v334_v12 = vpop.xlane.xlu0 %333 }
 0x115   : > { %v337_v13 = vadd.f32 1.0, %v334_v12 }
 0x117   : > { %v338_v16 = vmax.f32 %v337_v13, 0.0 }
 0x118   : > { %v336_v14 = vpop.xlane.xlu0 %335 }
 0x119   : > { %v339_v15 = vadd.f32 0.5, %v336_v14 }
 0x11b   : > { %v340_v17 = vmax.f32 %v339_v15, 0.0 }
 0x11d   : > { %v341_v18 = vadd.f32 %v340_v17, %v338_v16 }
 0x11f   : > { %343 = vst.msk [vmem:[%s320_s14] sm:$0xff] %vm342_vm0, %v341_v18 }
 0x120 PF: > { %p20_p6 = scmp.ge.s32.totalorder %s755_s20, 4   ;;  %s951_s15 = smov %s694_s16 }
 0x121   : > { %s952_s16 = smov %s698_s17  ;;  %s953_s17 = smov %s765_s23 }
 0x122   : > { %s954_s18 = smov %s755_s20  ;;  %22 = sbr.rel (!%p20_p6) target bundleno = 9 (0x9), region = 113 }
 0x127   :  { %363 = vsyncpa [#allocation3], 1 }
 0x128   :  { %365 = vsyncpa [#allocation3 + $0x1], 1 }
 0x129   :  { %366 = vsyncpa [#allocation5], 1 }
 0x12a   :  { %368 = vsyncpa [#allocation5 + $0x1], 1 }
 0x12b   :  { %369 = vsyncpa [#allocation8], 1 }
 0x12c   :  { %371 = vsyncpa [#allocation8 + $0x1], 1 }

</bundles_post_ra>
